<compile_context>
chip_gen: v7x
topology: tpu7x:2x2x1
jax: 0.10.0
libtpu: 0.0.40
codegen_flags: <defaults>
</compile_context>

<pallas_src>
import jax
import jax.numpy as jnp
from jax.experimental import pallas as pl
from jax.experimental.pallas import tpu as pltpu


def noice_channel_kernel(x_ref, w_ref, n_ref, o_ref):
    """out = x + w * n with channel / batch broadcasting (pure VPU work).

    x_ref: (B, C, HW)  images
    w_ref: (1, C, 1)   per-channel weights
    n_ref: (B, 1, HW)  per-batch noise plane (shared across channels)
    o_ref: (B, C, HW)  output
    """
    o_ref[...] = x_ref[...] + w_ref[...] * n_ref[...]


def _apply_noise(images, weights, noise):
    """Fused broadcast-multiply-add: images + weights * noise (NCHW in/out)."""
    b, c, h, w = images.shape
    hw = h * w
    # Contiguous collapses -> no data movement, just lane-dense tiled dims.
    x = images.reshape(b, c, hw)
    n = noise.reshape(b, 1, hw)
    wts = weights.reshape(1, c, 1)

    out = pl.pallas_call(
        noice_channel_kernel,
        out_shape=jax.ShapeDtypeStruct((b, c, hw), images.dtype),
        grid=(1,),
        in_specs=[
            pl.BlockSpec((b, c, hw), lambda i: (0, 0, 0)),
            pl.BlockSpec((1, c, 1), lambda i: (0, 0, 0)),
            pl.BlockSpec((b, 1, hw), lambda i: (0, 0, 0)),
        ],
        out_specs=pl.BlockSpec((b, c, hw), lambda i: (0, 0, 0)),
        compiler_params=pltpu.CompilerParams(
            dimension_semantics=("arbitrary",)),
    )(x, wts, n)
    return out.reshape(b, c, h, w)


def noice_channel(images, weights, key):
    """Full NoiceChannel forward: images + weights * randn(B, 1, H, W)."""
    b, c, h, w = images.shape
    noise = jax.random.normal(key, (b, 1, h, w), dtype=images.dtype)
    return _apply_noise(images, weights, noise)


def _reference_forward(images, weights, noise):
    """Pure-JAX reference mirroring the PyTorch module's forward."""
    return images + weights * noise


if __name__ == "__main__":
    N, C, H, W = 2, 4, 16, 16

    key = jax.random.PRNGKey(0)
    kx, kw, kn = jax.random.split(key, 3)

    images = jax.random.normal(kx, (N, C, H, W), dtype=jnp.float32)
    # Matches the module init: weights ~ N(0, 1) * 0.01 with shape (1, C, 1, 1).
    weights = 0.01 * jax.random.normal(kw, (1, C, 1, 1), dtype=jnp.float32)

    y = noice_channel(images, weights, kn)
    y = jax.block_until_ready(y)

    # Reference uses the identical noise (same key, same shape).
    noise = jax.random.normal(kn, (N, 1, H, W), dtype=jnp.float32)
    ref = _reference_forward(images, weights, noise)

    assert y.shape == (N, C, H, W)
    assert jnp.allclose(y, ref, atol=1e-6, rtol=1e-6), "mismatch vs reference"

    print("KERNEL_OK")
</pallas_src>

<mosaic_0001>
module attributes {stable_mosaic.version = 11 : i64} {
  func.func @noice_channel_kernel(%arg0: i32, %arg1: memref<2x4x256xf32, #tpu.memory_space<vmem>>, %arg2: memref<1x4x1xf32, #tpu.memory_space<vmem>>, %arg3: memref<2x1x256xf32, #tpu.memory_space<vmem>>, %arg4: memref<2x4x256xf32, #tpu.memory_space<vmem>>) attributes {dimension_semantics = [#tpu.dimension_semantics<arbitrary>], iteration_bounds = array<i64: 1>, scalar_prefetch = 0 : i64, scratch_operands = 0 : i64, tpu.core_type = #tpu.core_type<tc>, window_params = [{pipeline_mode = #tpu.pipeline_mode<synchronous>, transform_indices = @transform_0, window_bounds = array<i64: 2, 4, 256>}, {pipeline_mode = #tpu.pipeline_mode<synchronous>, transform_indices = @transform_1, window_bounds = array<i64: 1, 4, 1>}, {pipeline_mode = #tpu.pipeline_mode<synchronous>, transform_indices = @transform_2, window_bounds = array<i64: 2, 1, 256>}, {pipeline_mode = #tpu.pipeline_mode<synchronous>, transform_indices = @transform_3, window_bounds = array<i64: 2, 4, 256>}]} {
    %c0 = arith.constant 0 : index
    %c0_0 = arith.constant 0 : index
    %c0_1 = arith.constant 0 : index
    %0 = vector.load %arg1[%c0, %c0_0, %c0_1] : memref<2x4x256xf32, #tpu.memory_space<vmem>>, vector<2x4x256xf32>
    %c0_2 = arith.constant 0 : index
    %c0_3 = arith.constant 0 : index
    %c0_4 = arith.constant 0 : index
    %1 = vector.load %arg2[%c0_2, %c0_3, %c0_4] : memref<1x4x1xf32, #tpu.memory_space<vmem>>, vector<1x4x1xf32>
    %c0_5 = arith.constant 0 : index
    %c0_6 = arith.constant 0 : index
    %c0_7 = arith.constant 0 : index
    %2 = vector.load %arg3[%c0_5, %c0_6, %c0_7] : memref<2x1x256xf32, #tpu.memory_space<vmem>>, vector<2x1x256xf32>
    %3 = vector.broadcast %1 : vector<1x4x1xf32> to vector<2x4x256xf32>
    %4 = vector.broadcast %2 : vector<2x1x256xf32> to vector<2x4x256xf32>
    %5 = arith.mulf %3, %4 : vector<2x4x256xf32>
    %6 = arith.addf %0, %5 : vector<2x4x256xf32>
    %c0_8 = arith.constant 0 : index
    %c0_9 = arith.constant 0 : index
    %c0_10 = arith.constant 0 : index
    %7 = vector.load %arg4[%c0_8, %c0_9, %c0_10] : memref<2x4x256xf32, #tpu.memory_space<vmem>>, vector<2x4x256xf32>
    tpu.vector_store %arg4[%c0_8, %c0_9, %c0_10], %6 {strides = array<i32>} : memref<2x4x256xf32, #tpu.memory_space<vmem>>, vector<2x4x256xf32>,
    return
  }
  func.func @transform_0(%arg0: i32) -> (i32, i32, i32) {
    %c0_i32 = arith.constant 0 : i32
    %c0_i32_0 = arith.constant 0 : i32
    %c0_i32_1 = arith.constant 0 : i32
    %c0_i32_2 = arith.constant 0 : i32
    return %c0_i32, %c0_i32_0, %c0_i32_1 : i32, i32, i32
  }
  func.func @transform_1(%arg0: i32) -> (i32, i32, i32) {
    %c0_i32 = arith.constant 0 : i32
    %c0_i32_0 = arith.constant 0 : i32
    %c0_i32_1 = arith.constant 0 : i32
    %c0_i32_2 = arith.constant 0 : i32
    return %c0_i32, %c0_i32_0, %c0_i32_1 : i32, i32, i32
  }
  func.func @transform_2(%arg0: i32) -> (i32, i32, i32) {
    %c0_i32 = arith.constant 0 : i32
    %c0_i32_0 = arith.constant 0 : i32
    %c0_i32_1 = arith.constant 0 : i32
    %c0_i32_2 = arith.constant 0 : i32
    return %c0_i32, %c0_i32_0, %c0_i32_1 : i32, i32, i32
  }
  func.func @transform_3(%arg0: i32) -> (i32, i32, i32) {
    %c0_i32 = arith.constant 0 : i32
    %c0_i32_0 = arith.constant 0 : i32
    %c0_i32_1 = arith.constant 0 : i32
    %c0_i32_2 = arith.constant 0 : i32
    return %c0_i32, %c0_i32_0, %c0_i32_1 : i32, i32, i32
  }
}

</mosaic_0001>

<bundles_post_ra>
// kernel: tpu_custom_call.1
= control target key start
LH: loop header
LB: loop body
LE: loop exit
PB: predicated region body
PF: predicated region fallthrough
CT: control target
= control target key end

     0   :  { %8 = vsyncpa [#allocation3], 0  ;;  %s212_s0 = inlined_call_operand.hbm [shape: f32[2,4,256], index: 0, kind: input, shape index: {}]   ;;  %s213_s1 = inlined_call_operand.vmem [shape: f32[1,4,1], index: 1, kind: input, shape index: {}]   ;;  %s214_s2 = inlined_call_operand.vmem [shape: f32[2,1,256], index: 2, kind: input, shape index: {}]   ;;  %s215_s3 = inlined_call_operand.hbm [shape: f32[2,4,256], index: 3, kind: output, shape index: {}]  }
   0x1   :  { %9 = vsyncpa [#allocation4], 0  ;;  %s148_s12 = smov [#allocation2]   ;;  %s100_s16 = scalar_lea.hbm %s212_s0, 256 }
   0x2   :  { %s15_s13 = sshll.u32 %s148_s12, 4  ;;  %p101_p0 = scmp.ne.s32.totalorder %s212_s0, %s100_s16  ;;  %s16_s13 = int_to_ptr.vmem [resolvable:$true] %s15_s13 }
   0x3   :  { %p104_p1 = scmp.lt.u32.totalorder %s100_s16, %s212_s0 }
   0x5   :  { %p106_p2 = pnand %p104_p1, %p101_p0 }
   0x7   :  { %109 = shalt.err (!%p106_p2)
}
   0x8   :  { %s110_s21 = scalar_lea.vmem %s16_s13, 256  ;;  %p115_p4 = scmp.lt.s32.totalorder %s16_s13, %s16_s13 }
   0x9   :  { %p111_p3 = scmp.ne.s32.totalorder %s16_s13, %s110_s21  ;;  %p116_p5 = scmp.lt.s32.totalorder %s110_s21, %s110_s21 }
   0xb   :  { %p117_p6 = por %p116_p5, %p115_p4 }
   0xd   :  { %p118_p7 = pnand %p117_p6, %p111_p3 }
   0xf   :  { %121 = shalt.err (!%p118_p7)
}
  0x10   :  { %s149_s22 = smov 128   ;;  %s150_s23 = smov 8  }
  0x11   :  { %21 = dma.hbm_to_vmem [thread:$0]  %s212_s0, 256, %s16_s13, [#allocation3], %s149_s22, %s149_s22, %s150_s23  }
  0x12   :  { %144 = dma.done.wait [#allocation3], 256  }
  0x13   :  { %145 = vsyncadd [#allocation3], 4294967040  ;;  %v151_v0 = vmov 0   ;;  %v31_v1 = vld [vmem:[%s213_s1] sm:$0xf]  ;;  %v41_v2 = vlaneseq  ;;  %v30_v18 = vld [vmem:[#allocation2 + $0x8] sm:$0xff] }
  0x14   :  { %99 = vset.pattern.permute.xlu0 %v151_v0  ;;  %v32_v6 = vld [vmem:[%s214_s2] sm:$0x3]  ;;  %v33_v7 = vld [vmem:[%s214_s2 + $0x2] sm:$0x3]  ;;  %s152_s0 = smov [#allocation5]  }
  0x15   :  { %36 = vperm.xlu0 %99, %v31_v1   ;;  %v42_v3 = vshrl.u32 %v41_v2, 7  ;;  %v29_v17 = vld [vmem:[#allocation2] sm:$0xff]  ;;  %s82_s1 = sshll.u32 %s152_s0, 4  ;;  %s83_s1 = int_to_ptr.vmem [resolvable:$true] %s82_s1 }
  0x16   :  { %s122_s2 = scalar_lea.vmem %s83_s1, 256  ;;  %p127_p9 = scmp.lt.s32.totalorder %s83_s1, %s83_s1 }
  0x17   :  { %v43_v4 = vsub.s32 0, %v42_v3  ;;  %v47_v5 = vsub.s32 1, %v42_v3  ;;  %p123_p8 = scmp.ne.s32.totalorder %s83_s1, %s122_s2  ;;  %p128_p10 = scmp.lt.s32.totalorder %s122_s2, %s122_s2 }
  0x19   :  { %v44_v8 = vrot.slane %v32_v6, %v43_v4  ;;  %v48_v9 = vrot.slane %v32_v6, %v47_v5  ;;  %v52_v10 = vrot.slane %v33_v7, %v43_v4  ;;  %v56_v11 = vrot.slane %v33_v7, %v47_v5  ;;  %p129_p11 = por %p128_p10, %p127_p9 }
  0x1b   :  { %p130_p12 = pnand %p129_p11, %p123_p8 }
  0x94   :  { %v37_v12 = vpop.permute.xlu0 %36 }
  0x95   :  { %v61_v13 = vmul.f32 %v44_v8, %v37_v12  ;;  %v62_v14 = vmul.f32 %v48_v9, %v37_v12  ;;  %v63_v15 = vmul.f32 %v52_v10, %v37_v12  ;;  %v64_v16 = vmul.f32 %v56_v11, %v37_v12 }
  0x97   :  { %v69_v19 = vcombine.low %v61_v13, %v62_v14  ;;  %v70_v20 = vcombine.low %v63_v15, %v64_v16 }
  0x99   :  { %v73_v21 = vadd.f32 %v69_v19, %v29_v17  ;;  %v74_v22 = vadd.f32 %v70_v20, %v30_v18 }
  0x9b   :  { %75 = vst [vmem:[#allocation5] sm:$0xff] %v73_v21  ;;  %76 = vst [vmem:[#allocation5 + $0x8] sm:$0xff] %v74_v22 }
  0x9c   :  { %133 = shalt.err (!%p130_p12)
}
  0x9d   :  { %s134_s7 = scalar_lea.hbm %s215_s3, 256 }
  0x9e   :  { %p135_p13 = scmp.ne.s32.totalorder %s215_s3, %s134_s7  ;;  %p138_p0 = scmp.lt.u32.totalorder %s134_s7, %s215_s3 }
  0xa0   :  { %p140_p1 = pnand %p138_p0, %p135_p13 }
  0xa2   :  { %143 = shalt.err (!%p140_p1)
}
  0xa3   :  { %88 = dma.vmem_to_hbm [thread:$0]  %s83_s1, 256, %s215_s3, [#allocation4], %s149_s22, %s149_s22, %s150_s23  }
  0xa4   :  { %146 = dma.done.wait [#allocation4], 256  }
  0xa5   :  { %147 = vsyncadd [#allocation4], 4294967040 }
  0xa6   :  { %92 = vsyncpa [#allocation3], 1 }
  0xa7   :  { %93 = vsyncpa [#allocation4], 1 }

</bundles_post_ra>
